<compile_context>
chip_gen: v7x
topology: tpu7x:2x2x1
jax: 0.10.0
libtpu: 0.0.40
codegen_flags: <defaults>
</compile_context>

<pallas_src>
import numpy as np
import jax
import jax.numpy as jnp
from jax.experimental import pallas as pl
from jax.experimental.pallas import tpu as pltpu


_VMEM_LIMIT = 32 * 1024 * 1024     # fits every generation's scoped-VMEM budget
_TARGET_TILE_BYTES = 4 << 20       # ~4 MiB output tiles (amortizes ~0.35us/step)
_MAX_FEATURE_BLOCK = 128           # expansion matmul K; MXU minimum pass width


# --------------------------------------------------------------------------- #
# Kernels
# --------------------------------------------------------------------------- #
def _ple_kernel(x_ref, e_ref, w_ref, b_ref, lo_ref, hi_ref, o_ref):
    """One (bb, fb) x-tile -> one (bb, fb*M) lane-dense output tile.

    x_ref : (bb, fb)        input features
    e_ref : (fb, fb*M)      0/1 block-diagonal expansion matrix, bf16
    w_ref/b_ref : (1, fb*M) flattened weight / bias
    lo_ref/hi_ref : (1, fb*M) per-channel clamp bounds (+-inf == no clamp)
    o_ref : (bb, fb*M)
    """
    x = x_ref[...]
    # Manual 3-term bf16 split of x (== BF16_BF16_F32_X3, spelled out so it
    # lowers on any Mosaic version).  Each term is a single native bf16 MXU
    # pass (3 passes total vs 6 for Precision.HIGHEST).  E is exactly 0/1, so
    # the reconstructed replication of x is within ~1 f32 ulp.
    x1 = x.astype(jnp.bfloat16)
    r1 = x - x1.astype(jnp.float32)
    x2 = r1.astype(jnp.bfloat16)
    x3 = (r1 - x2.astype(jnp.float32)).astype(jnp.bfloat16)
    e = e_ref[...]
    x_exp = (jnp.dot(x1, e, preferred_element_type=jnp.float32)
             + jnp.dot(x2, e, preferred_element_type=jnp.float32)
             + jnp.dot(x3, e, preferred_element_type=jnp.float32))
    y = x_exp * w_ref[...] + b_ref[...]
    y = jnp.minimum(jnp.maximum(y, lo_ref[...]), hi_ref[...])
    o_ref[...] = y.astype(o_ref.dtype)


def _ple_m1_kernel(x_ref, w_ref, b_ref, o_ref):
    """max_n_bins == 1: pure elementwise affine, no clamps, no expansion matmul."""
    o_ref[...] = (x_ref[...] * w_ref[...] + b_ref[...]).astype(o_ref.dtype)


# --------------------------------------------------------------------------- #
# Host-side helpers
# --------------------------------------------------------------------------- #
def _make_clamp_bounds(F, M, single_bin_mask):
    """Per-(feature, channel) lo/hi bounds encoding the PLE clamp rules (M >= 2)."""
    lo = np.zeros((F, M), np.float32)
    hi = np.ones((F, M), np.float32)
    lo[:, 0] = -np.inf            # channel 0: clamp_max(1) only
    hi[:, -1] = np.inf            # last channel: clamp_min(0) only
    if single_bin_mask is not None:
        sbm = np.asarray(single_bin_mask, bool)
        lo[sbm, -1] = -np.inf     # single-bin features: last channel unclamped
    return lo, hi


def _choose_block_b(B, row_bytes, block_b=None):
    """Batch-tile rows: ~4 MiB output tile, >=2 blocks, prefer an even block count."""
    if block_b is not None:
        bb = int(block_b)
        return B if bb >= B else max(8, (bb // 8) * 8)
    if B <= 16:
        return B                                  # one full-extent block
    bb = max(1, _TARGET_TILE_BYTES // max(int(row_bytes), 1))
    bb = min(bb, (B + 1) // 2)                    # >= 2 blocks (v7x has 2 TCs)
    bb = max(8, (bb // 8) * 8)
    if pl.cdiv(B, bb) % 2:                        # even block count if cheap
        cand = bb - 8
        while cand >= max(8, bb // 2):
            if pl.cdiv(B, cand) % 2 == 0:
                return cand
            cand -= 8
    return bb


# --------------------------------------------------------------------------- #
# Wrapper
# --------------------------------------------------------------------------- #
def piecewise_linear_encoding(x, weight, bias, single_bin_mask=None, *,
                              block_b=None, out_dtype=None):
    """x: (*, F) float; weight/bias: (F, M); single_bin_mask: (F,) bool or None.

    Returns (*, F, M), matching _PiecewiseLinearEncodingImpl.forward.
    Pass out_dtype=jnp.bfloat16 when downstream accepts it (halves store BW;
    compute stays f32 in-kernel).
    """
    x = jnp.asarray(x, jnp.float32)
    lead = x.shape[:-1]
    F = x.shape[-1]
    Fw, M = weight.shape
    assert Fw == F
    out_dtype = x.dtype if out_dtype is None else out_dtype
    out_itemsize = np.dtype(out_dtype).itemsize
    B = int(np.prod(lead)) if lead else 1
    x2 = x.reshape(B, F)

    # ------------------------- M == 1: elementwise path ---------------------- #
    if M == 1:
        w_flat = jnp.reshape(jnp.asarray(weight, jnp.float32), (1, F))
        b_flat = jnp.reshape(jnp.asarray(bias, jnp.float32), (1, F))
        bb = _choose_block_b(B, F * out_itemsize, block_b)
        out = pl.pallas_call(
            _ple_m1_kernel,
            out_shape=jax.ShapeDtypeStruct((B, F), out_dtype),
            grid_spec=pltpu.PrefetchScalarGridSpec(
                num_scalar_prefetch=0,
                grid=(pl.cdiv(B, bb),),
                in_specs=[
                    pl.BlockSpec((bb, F), lambda i: (i, 0)),
                    pl.BlockSpec((1, F), lambda i: (0, 0),
                                 pipeline_mode=pl.Buffered(1)),
                    pl.BlockSpec((1, F), lambda i: (0, 0),
                                 pipeline_mode=pl.Buffered(1)),
                ],
                out_specs=pl.BlockSpec((bb, F), lambda i: (i, 0)),
            ),
            compiler_params=pltpu.CompilerParams(
                dimension_semantics=("parallel",),
                vmem_limit_bytes=_VMEM_LIMIT,
            ),
        )(x2, w_flat, b_flat)
        return out.reshape(*lead, F, 1)

    # ---------------------- M >= 2: MXU-expansion path ----------------------- #
    lo_np, hi_np = _make_clamp_bounds(F, M, single_bin_mask)
    w_np = np.asarray(weight, np.float32)
    b_np = np.asarray(bias, np.float32)

    if F <= _MAX_FEATURE_BLOCK:
        fb, Fp = F, F
    else:
        fb = _MAX_FEATURE_BLOCK
        Fp = pl.cdiv(F, fb) * fb
        if Fp != F:
            # Zero-pad the feature axis so every feature block is full (garbage
            # reads would poison valid lanes through the matmul).  Costs one
            # extra copy of x and of the output slice.
            # TODO(synk): avoid via in-kernel lane masking + ragged lane writes.
            pad = Fp - F
            x2 = jnp.pad(x2, ((0, 0), (0, pad)))
            w_np = np.pad(w_np, ((0, pad), (0, 0)))
            b_np = np.pad(b_np, ((0, pad), (0, 0)))
            lo_np = np.pad(lo_np, ((0, pad), (0, 0)), constant_values=-np.inf)
            hi_np = np.pad(hi_np, ((0, pad), (0, 0)), constant_values=np.inf)

    w_flat = jnp.asarray(w_np.reshape(1, Fp * M))
    b_flat = jnp.asarray(b_np.reshape(1, Fp * M))
    lo_flat = jnp.asarray(lo_np.reshape(1, Fp * M))
    hi_flat = jnp.asarray(hi_np.reshape(1, Fp * M))

    # 0/1 block-diagonal expansion matrix, bf16 (exact), identical for every
    # feature block.
    e_mat = jnp.asarray(np.repeat(np.eye(fb, dtype=np.float32), M, axis=1),
                        jnp.bfloat16)

    bb = _choose_block_b(B, fb * M * out_itemsize, block_b)
    grid = (pl.cdiv(B, bb), Fp // fb)

    out_flat = pl.pallas_call(
        _ple_kernel,
        out_shape=jax.ShapeDtypeStruct((B, Fp * M), out_dtype),
        grid_spec=pltpu.PrefetchScalarGridSpec(
            num_scalar_prefetch=0,
            grid=grid,
            in_specs=[
                pl.BlockSpec((bb, fb), lambda i, j: (i, j)),           # x
                pl.BlockSpec((fb, fb * M), lambda i, j: (0, 0),        # E (invariant)
                             pipeline_mode=pl.Buffered(1)),
                pl.BlockSpec((1, fb * M), lambda i, j: (0, j)),        # weight
                pl.BlockSpec((1, fb * M), lambda i, j: (0, j)),        # bias
                pl.BlockSpec((1, fb * M), lambda i, j: (0, j)),        # lo
                pl.BlockSpec((1, fb * M), lambda i, j: (0, j)),        # hi
            ],
            out_specs=pl.BlockSpec((bb, fb * M), lambda i, j: (i, j)),
        ),
        compiler_params=pltpu.CompilerParams(
            dimension_semantics=("parallel", "parallel"),
            vmem_limit_bytes=_VMEM_LIMIT,
        ),
    )(x2, e_mat, w_flat, b_flat, lo_flat, hi_flat)

    if Fp != F:
        out_flat = out_flat[:, : F * M]
    return out_flat.reshape(*lead, F, M)   # free: row-major contiguous


# --------------------------------------------------------------------------- #
# Parameter construction + pure-JAX reference (PyTorch semantics)
# --------------------------------------------------------------------------- #
def make_ple_params(bins):
    """Replicates _PiecewiseLinearEncodingImpl.__init__ (deterministic, no torch)."""
    n_features = len(bins)
    n_bins = [len(e) - 1 for e in bins]
    max_n_bins = max(n_bins)
    weight = np.zeros((n_features, max_n_bins), np.float32)
    bias = np.zeros((n_features, max_n_bins), np.float32)
    single_bin_mask = np.array([nb == 1 for nb in n_bins])
    for i, edges in enumerate(bins):
        edges = np.asarray(edges, np.float32)
        width = np.diff(edges)
        w = 1.0 / width
        b = -edges[:-1] / width
        weight[i, -1] = w[-1]
        bias[i, -1] = b[-1]
        weight[i, : n_bins[i] - 1] = w[:-1]
        bias[i, : n_bins[i] - 1] = b[:-1]
    sbm = single_bin_mask if single_bin_mask.any() else None
    return (
        jnp.asarray(weight),
        jnp.asarray(bias),
        None if sbm is None else jnp.asarray(sbm),
        max_n_bins,
    )


def reference_ple(x, weight, bias, single_bin_mask):
    """Pure-JAX reference mirroring the PyTorch forward (supports leading dims)."""
    y = bias + weight * x[..., None]
    M = y.shape[-1]
    if M > 1:
        first = jnp.minimum(y[..., :1], 1.0)
        mid = jnp.clip(y[..., 1:-1], 0.0, 1.0)
        last = y[..., -1:]
        last_clamped = jnp.maximum(last, 0.0)
        if single_bin_mask is None:
            last = last_clamped
        else:
            last = jnp.where(single_bin_mask[:, None], last, last_clamped)
        y = jnp.concatenate([first, mid, last], axis=-1)
    return y


# --------------------------------------------------------------------------- #
# Demo / self-test
# --------------------------------------------------------------------------- #
if __name__ == "__main__":
    # ---- Test 1: bins (8, 4, 1, 8) -> M = 8, single-bin feature, ragged batch.
    bins = [
        np.linspace(-2.0, 2.0, 9),   # 8 bins (max)
        np.linspace(-1.0, 3.0, 5),   # 4 bins
        np.array([-0.5, 0.5]),       # 1 bin -> single_bin_mask active
        np.linspace(0.0, 4.0, 9),    # 8 bins
    ]
    weight, bias, single_bin_mask, max_n_bins = make_ple_params(bins)
    B, F = 100, len(bins)            # 100 rows -> 4 tiles of 32, last one ragged
    x = jax.random.normal(jax.random.PRNGKey(0), (B, F), dtype=jnp.float32)

    out = jax.block_until_ready(
        piecewise_linear_encoding(x, weight, bias, single_bin_mask))
    ref = reference_ple(x, weight, bias, single_bin_mask)
    assert out.shape == (B, F, max_n_bins)
    np.testing.assert_allclose(np.asarray(out), np.asarray(ref),
                               rtol=1e-5, atol=5e-6)

    # bf16 output (recommended downstream: halves store bandwidth).
    out_bf16 = jax.block_until_ready(
        piecewise_linear_encoding(x, weight, bias, single_bin_mask,
                                  out_dtype=jnp.bfloat16))
    np.testing.assert_allclose(np.asarray(out_bf16, np.float32), np.asarray(ref),
                               rtol=1e-2, atol=1e-2)

    # ---- Test 2: all single-bin features -> M = 1 (no-matmul path), leading dims.
    bins1 = [np.array([-1.0, 1.0]), np.array([0.0, 2.0]), np.array([-3.0, 0.0])]
    w1, b1, sbm1, m1 = make_ple_params(bins1)
    x1 = jax.random.normal(jax.random.PRNGKey(1), (2, 8, len(bins1)), jnp.float32)
    out1 = jax.block_until_ready(piecewise_linear_encoding(x1, w1, b1, sbm1))
    ref1 = reference_ple(x1, w1, b1, sbm1)
    assert out1.shape == (2, 8, len(bins1), m1)
    np.testing.assert_allclose(np.asarray(out1), np.asarray(ref1),
                               rtol=1e-5, atol=1e-6)

    # ---- Test 3: F = 160 > 128 (feature axis padded to 256, two feature blocks),
    # mixed bin counts incl. single-bin features, ragged batch.
    bins3 = []
    for i in range(160):
        nb = (4, 1, 2, 3)[i % 4]
        lo_e = -2.0 + 0.01 * i
        bins3.append(np.linspace(lo_e, lo_e + 1.0 + 0.05 * (i % 7), nb + 1))
    w3, b3, sbm3, m3 = make_ple_params(bins3)
    x3 = jax.random.normal(jax.random.PRNGKey(2), (50, 160), dtype=jnp.float32)
    out3 = jax.block_until_ready(piecewise_linear_encoding(x3, w3, b3, sbm3))
    ref3 = reference_ple(x3, w3, b3, sbm3)
    assert out3.shape == (50, 160, m3)
    np.testing.assert_allclose(np.asarray(out3), np.asarray(ref3),
                               rtol=1e-5, atol=5e-6)

    print("KERNEL_OK")
</pallas_src>

<mosaic_0001>
module attributes {stable_mosaic.version = 11 : i64} {
  func.func @_ple_kernel(%arg0: i32, %arg1: i32, %arg2: memref<32x4xf32, #tpu.memory_space<vmem>>, %arg3: memref<4x32xbf16, #tpu.memory_space<vmem>>, %arg4: memref<1x32xf32, #tpu.memory_space<vmem>>, %arg5: memref<1x32xf32, #tpu.memory_space<vmem>>, %arg6: memref<1x32xf32, #tpu.memory_space<vmem>>, %arg7: memref<1x32xf32, #tpu.memory_space<vmem>>, %arg8: memref<32x32xf32, #tpu.memory_space<vmem>>) attributes {dimension_semantics = [#tpu.dimension_semantics<parallel>, #tpu.dimension_semantics<parallel>], iteration_bounds = array<i64: 4, 1>, scalar_prefetch = 0 : i64, scratch_operands = 0 : i64, tpu.core_type = #tpu.core_type<tc>, window_params = [{transform_indices = @transform_0, window_bounds = array<i64: 32, 4>}, {pipeline_mode = #tpu.pipeline_mode<synchronous>, transform_indices = @transform_1, window_bounds = array<i64: 4, 32>}, {transform_indices = @transform_2, window_bounds = array<i64: 1, 32>}, {transform_indices = @transform_3, window_bounds = array<i64: 1, 32>}, {transform_indices = @transform_4, window_bounds = array<i64: 1, 32>}, {transform_indices = @transform_5, window_bounds = array<i64: 1, 32>}, {transform_indices = @transform_6, window_bounds = array<i64: 32, 32>}]} {
    %c0 = arith.constant 0 : index
    %c0_0 = arith.constant 0 : index
    %0 = vector.load %arg2[%c0, %c0_0] : memref<32x4xf32, #tpu.memory_space<vmem>>, vector<32x4xf32>
    %1 = arith.truncf %0 : vector<32x4xf32> to vector<32x4xbf16>
    %2 = arith.extf %1 : vector<32x4xbf16> to vector<32x4xf32>
    %3 = arith.subf %0, %2 : vector<32x4xf32>
    %4 = arith.truncf %3 : vector<32x4xf32> to vector<32x4xbf16>
    %5 = arith.extf %4 : vector<32x4xbf16> to vector<32x4xf32>
    %6 = arith.subf %3, %5 : vector<32x4xf32>
    %7 = arith.truncf %6 : vector<32x4xf32> to vector<32x4xbf16>
    %c0_1 = arith.constant 0 : index
    %c0_2 = arith.constant 0 : index
    %8 = vector.load %arg3[%c0_1, %c0_2] : memref<4x32xbf16, #tpu.memory_space<vmem>>, vector<4x32xbf16>
    %cst = arith.constant dense<0.000000e+00> : vector<32x32xf32>
    %9 = tpu.matmul %1, %8, %cst {dimension_numbers = #tpu.dot_dimension_numbers<[1], [0], [0], [1], [0, 0, 1, 1], [], []>} : vector<32x4xbf16>, vector<4x32xbf16>, vector<32x32xf32> -> vector<32x32xf32>
    %cst_3 = arith.constant dense<0.000000e+00> : vector<32x32xf32>
    %10 = tpu.matmul %4, %8, %cst_3 {dimension_numbers = #tpu.dot_dimension_numbers<[1], [0], [0], [1], [0, 0, 1, 1], [], []>} : vector<32x4xbf16>, vector<4x32xbf16>, vector<32x32xf32> -> vector<32x32xf32>
    %11 = arith.addf %9, %10 : vector<32x32xf32>
    %cst_4 = arith.constant dense<0.000000e+00> : vector<32x32xf32>
    %12 = tpu.matmul %7, %8, %cst_4 {dimension_numbers = #tpu.dot_dimension_numbers<[1], [0], [0], [1], [0, 0, 1, 1], [], []>} : vector<32x4xbf16>, vector<4x32xbf16>, vector<32x32xf32> -> vector<32x32xf32>
    %13 = arith.addf %11, %12 : vector<32x32xf32>
    %c0_5 = arith.constant 0 : index
    %c0_6 = arith.constant 0 : index
    %14 = vector.load %arg4[%c0_5, %c0_6] : memref<1x32xf32, #tpu.memory_space<vmem>>, vector<1x32xf32>
    %15 = vector.broadcast %14 : vector<1x32xf32> to vector<32x32xf32>
    %16 = arith.mulf %13, %15 : vector<32x32xf32>
    %c0_7 = arith.constant 0 : index
    %c0_8 = arith.constant 0 : index
    %17 = vector.load %arg5[%c0_7, %c0_8] : memref<1x32xf32, #tpu.memory_space<vmem>>, vector<1x32xf32>
    %18 = vector.broadcast %17 : vector<1x32xf32> to vector<32x32xf32>
    %19 = arith.addf %16, %18 : vector<32x32xf32>
    %c0_9 = arith.constant 0 : index
    %c0_10 = arith.constant 0 : index
    %20 = vector.load %arg6[%c0_9, %c0_10] : memref<1x32xf32, #tpu.memory_space<vmem>>, vector<1x32xf32>
    %21 = vector.broadcast %20 : vector<1x32xf32> to vector<32x32xf32>
    %22 = arith.maximumf %19, %21 : vector<32x32xf32>
    %c0_11 = arith.constant 0 : index
    %c0_12 = arith.constant 0 : index
    %23 = vector.load %arg7[%c0_11, %c0_12] : memref<1x32xf32, #tpu.memory_space<vmem>>, vector<1x32xf32>
    %24 = vector.broadcast %23 : vector<1x32xf32> to vector<32x32xf32>
    %25 = arith.minimumf %22, %24 : vector<32x32xf32>
    %c0_13 = arith.constant 0 : index
    %c0_14 = arith.constant 0 : index
    %26 = vector.load %arg8[%c0_13, %c0_14] : memref<32x32xf32, #tpu.memory_space<vmem>>, vector<32x32xf32>
    tpu.vector_store %arg8[%c0_13, %c0_14], %25 {strides = array<i32>} : memref<32x32xf32, #tpu.memory_space<vmem>>, vector<32x32xf32>,
    return
  }
  func.func @transform_0(%arg0: i32, %arg1: i32) -> (i32, i32) {
    %c0_i32 = arith.constant 0 : i32
    return %arg0, %arg1 : i32, i32
  }
  func.func @transform_1(%arg0: i32, %arg1: i32) -> (i32, i32) {
    %c0_i32 = arith.constant 0 : i32
    %c0_i32_0 = arith.constant 0 : i32
    %c0_i32_1 = arith.constant 0 : i32
    return %c0_i32, %c0_i32_0 : i32, i32
  }
  func.func @transform_2(%arg0: i32, %arg1: i32) -> (i32, i32) {
    %c0_i32 = arith.constant 0 : i32
    %c0_i32_0 = arith.constant 0 : i32
    return %c0_i32, %arg1 : i32, i32
  }
  func.func @transform_3(%arg0: i32, %arg1: i32) -> (i32, i32) {
    %c0_i32 = arith.constant 0 : i32
    %c0_i32_0 = arith.constant 0 : i32
    return %c0_i32, %arg1 : i32, i32
  }
  func.func @transform_4(%arg0: i32, %arg1: i32) -> (i32, i32) {
    %c0_i32 = arith.constant 0 : i32
    %c0_i32_0 = arith.constant 0 : i32
    return %c0_i32, %arg1 : i32, i32
  }
  func.func @transform_5(%arg0: i32, %arg1: i32) -> (i32, i32) {
    %c0_i32 = arith.constant 0 : i32
    %c0_i32_0 = arith.constant 0 : i32
    return %c0_i32, %arg1 : i32, i32
  }
  func.func @transform_6(%arg0: i32, %arg1: i32) -> (i32, i32) {
    %c0_i32 = arith.constant 0 : i32
    return %arg0, %arg1 : i32, i32
  }
}

</mosaic_0001>

<bundles_post_ra>
// kernel: tpu_custom_call.1
= control target key start
LH: loop header
LB: loop body
LE: loop exit
PB: predicated region body
PF: predicated region fallthrough
CT: control target
= control target key end

     0   :  { %s1217_s21 = smov 0   ;;  %s1219_s22 = smov 0   ;;  %s1357_s0 = inlined_call_operand.vmem [shape: f32[100,4], index: 0, kind: input, shape index: {}]   ;;  %s1358_s1 = inlined_call_operand.vmem [shape: bf16[4,32], index: 1, kind: input, shape index: {}]   ;;  %s1359_s2 = inlined_call_operand.vmem [shape: f32[1,32], index: 2, kind: input, shape index: {}]   ;;  %s1360_s3 = inlined_call_operand.vmem [shape: f32[1,32], index: 3, kind: input, shape index: {}]   ;;  %s1361_s4 = inlined_call_operand.vmem [shape: f32[1,32], index: 4, kind: input, shape index: {}]   ;;  %s1362_s5 = inlined_call_operand.vmem [shape: f32[1,32], index: 5, kind: input, shape index: {}]   ;;  %s1363_s6 = inlined_call_operand.vmem [shape: f32[100,32], index: 6, kind: output, shape index: {}]  }
   0x1   :  { %s1221_s23 = smov 0   ;;  %s1223_s24 = smov 0  }
   0x2   :  { %s1225_s25 = smov 0  }
   0x3 LB: > { %s894_s26 = sadd.s32 4294967295, %s1148_s25   ;;  %s28_s27 = sadd.s32 1, %s1144_s24  ;;  %s1148_s25 = sphi %s1225_s25, %s16_s25   ;;  %s1144_s24 = sphi %s1223_s24, %s1371_s24   ;;  %s1140_s23 = sphi %s1221_s23, %s1370_s23   ;;  %s1136_s22 = sphi %s1219_s22, %s1369_s22   ;;  %s1132_s21 = sphi %s1217_s21, %s1368_s21  }
   0x4   : > { %p30_p0 = scmp.ge.s32.totalorder %s28_s27, 4  ;;  %s190_s28 = sadd.s32 1, %s1136_s22 }
   0x5   : > { %p200_p1 = scmp.ne.s32.totalorder %s1136_s22, %s1132_s21  ;;  %p201_p2 = scmp.eq.s32.totalorder %s894_s26, 3 }
   0x6   : > { %s1373_s27 = smov (%p30_p0, %s28_s27), 0  ;;  %p902_p4 = scmp.ge.s32.totalorder %s1148_s25, 1 }
   0x7   : > { %p1249_p3 = por %p201_p2, %p200_p1  ;;  %s185_s30 = ssub.s32 %s1144_s24, %s1373_s27 }
   0x8   : > { %p272_p5 = scmp.lt.s32.totalorder %s1148_s25, 5  ;;  %p188_p6 = scmp.eq.s32.totalorder %s185_s30, 0 }
   0xa   : > { %p273_p7 = pnand %p902_p4, %p272_p5 }
   0xb   : > { %s1258_s7 = scalar_select %p188_p6, %s1136_s22, %s190_s28  }
   0xc   : > { %276 = sbr.rel (%p273_p7) target bundleno = 314 (0x13a), region = 44  ;;  %v381_v0 = vld [vmem:[%s1358_s1] sm:$0x3] (!%p273_p7)  ;;  %vm389_vm0 = vcmask (!%p273_p7), 1041408   ;;  %s1264_s10 = sshll.u32 (!%p273_p7), %s1140_s23, 2  ;;  %vm382_vm1 = vcmask (!%p273_p7), 31744  }
   0xd   : > { %972 = vmatprep.subr.msk.bf16.mxu0 (!%p273_p7), %vm389_vm0, %v381_v0  ;;  %v391_v1 = vsel (!%p273_p7), %vm389_vm0, %v381_v0, 0  ;;  %p325_p8 = scmp.lt.s32.totalorder (!%p273_p7), %s1264_s10, 12  ;;  %971 = vmatprep.subr.msk.bf16.mxu1 (!%p273_p7), %vm389_vm0, %v381_v0  ;;  %v912_v33 = vld [vmem:[%s1359_s2] ss:$0 sm:$0xff] (!%p273_p7)  ;;  %s317_s18 = sand.u32 (!%p273_p7), 1, %s1132_s21   ;;  %vm600_vm2 = vcmask (!%p273_p7), 261120  }
   0xe   : > { %952 = vmatpush3.bf16.msra.mxu0 (!%p273_p7), %v391_v1  ;;  %946 = vmatpush3.bf16.msra.mxu1 (!%p273_p7), %v391_v1  ;;  %v913_v36 = vld [vmem:[%s1360_s3] ss:$0 sm:$0xff] (!%p273_p7)  ;;  %s903_s30 = sshll.u32 (!%p273_p7), %s317_s18, 5 }
   0xf   : > { %973 = vmatprep.subr.msk.bf16.mxu0 (!%p273_p7), %vm389_vm0, %v381_v0  ;;  %v914_v42 = vld [vmem:[%s1361_s4] ss:$0 sm:$0xff] (!%p273_p7)  ;;  %s1290_s9 = scalar_lea.vmem (!%p273_p7), [#allocation2], %s903_s30  }
  0x10   : > { %v915_v47 = vld [vmem:[%s1362_s5] ss:$0 sm:$0xff] (!%p273_p7) }
  0x13   : > { %s326_s11 = scalar_select %p325_p8, %s1264_s10, 12 }
  0x15   : > { %s905_s12 = sshll.u32 %s326_s11, 3  ;;  %s613_s11 = ssub.s32 (%p1249_p3), 13, %s1264_s10 }
  0x16   : > { %s331_s15 = scalar_lea.vmem %s1357_s0, %s905_s12  ;;  %s933_s12 = sshll.u32 (%p1249_p3), %s1140_s23, 5 }
  0x17   : > { %v355_v2 = vld [vmem:[%s331_s15] sm:$0xff]  ;;  %v356_v3 = vld [vmem:[%s331_s15 + $0x8] sm:$0xff]  ;;  %v357_v4 = vld [vmem:[%s331_s15 + $0x10] sm:$0xff]  ;;  %p614_p9 = scmp.lt.s32.totalorder (%p1249_p3), %s613_s11, 4 }
  0x18   : > { %v359_v5 = vpack.c.bf16 %v356_v3, %v355_v2  ;;  %v358_v6 = vld [vmem:[%s331_s15 + $0x18] sm:$0xff]  ;;  %s1303_s15 = scalar_lea.vmem (%p1249_p3), %s1363_s6, %s933_s12  }
  0x19   : > { %v360_v7 = vpack.c.bf16 %v358_v6, %v357_v4 }
  0x1a   : > { %953 = vmatprep.mubr.msk.bf16.mxu0 %vm382_vm1, %v359_v5  ;;  %v361_v8 = vunpack.c.l.bf16 %v359_v5  ;;  %v362_v9 = vunpack.c.h.bf16 %v359_v5 }
  0x1b   : > { %954 = vmatmul.mubr.msk.bf16.vlgmr.msra.gmra.mrb[0].mxu0 %vm382_vm1, %v360_v7  ;;  %v363_v10 = vunpack.c.l.bf16 %v360_v7  ;;  %v364_v11 = vunpack.c.h.bf16 %v360_v7 }
  0x1c   : > { %958 = vmatpush3.bf16.msra.mxu0 %v391_v1  ;;  %v365_v12 = vsub.f32 %v355_v2, %v361_v8  ;;  %v366_v13 = vsub.f32 %v356_v3, %v362_v9 }
  0x1d   : > { %v367_v14 = vsub.f32 %v357_v4, %v363_v10  ;;  %v368_v15 = vsub.f32 %v358_v6, %v364_v11 }
  0x1e   : > { %v369_v16 = vpack.c.bf16 %v366_v13, %v365_v12 }
  0x1f   : > { %v370_v17 = vpack.c.bf16 %v368_v15, %v367_v14 }
  0x20   : > { %v371_v18 = vunpack.c.l.bf16 %v369_v16  ;;  %v372_v19 = vunpack.c.h.bf16 %v369_v16  ;;  %947 = vmatprep.mubr.msk.bf16.mxu1 %vm382_vm1, %v369_v16 }
  0x21   : > { %v373_v20 = vunpack.c.l.bf16 %v370_v17  ;;  %v374_v21 = vunpack.c.h.bf16 %v370_v17  ;;  %948 = vmatmul.mubr.msk.bf16.vlgmr.msra.gmra.mrb[0].mxu1 %vm382_vm1, %v370_v17 }
  0x22   : > { %v375_v22 = vsub.f32 %v365_v12, %v371_v18  ;;  %v376_v23 = vsub.f32 %v366_v13, %v372_v19 }
  0x23   : > { %v377_v24 = vsub.f32 %v367_v14, %v373_v20  ;;  %v378_v25 = vsub.f32 %v368_v15, %v374_v21 }
  0x24   : > { %v379_v26 = vpack.c.bf16 %v376_v23, %v375_v22 }
  0x25   : > { %v380_v27 = vpack.c.bf16 %v378_v25, %v377_v24 }
  0x26   : > { %959 = vmatprep.mubr.msk.bf16.mxu0 %vm382_vm1, %v379_v26 }
  0x27   : > { %960 = vmatmul.mubr.msk.bf16.vlgmr.msra.gmra.mrb[0].mxu0 %vm382_vm1, %v380_v27 }
  0xf4   : > { %v949_v28 = vpop.f32.mrb[0].mxu1 }
  0xf5   : > { %v427_v29 = vpop.f32.mrb[1].mxu1 }
  0xf6   : > { %v950_v30 = vpop.f32.mrb[2].mxu1 }
  0xf7   : > { %v430_v31 = vpop.f32.mrb[3].mxu1 }
  0xfa   : > { %v961_v32 = vpop.f32.mrb[0].mxu0 }
  0xfb   : > { %v963_v34 = vadd.f32 %v961_v32, %v949_v28  ;;  %v537_v35 = vpop.f32.mrb[1].mxu0 }
  0xfc   : > { %v964_v37 = vadd.f32 %v537_v35, %v427_v29  ;;  %v962_v38 = vpop.f32.mrb[2].mxu0 }
  0xfd   : > { %v565_v39 = vmul.f32 %v963_v34, %v912_v33  ;;  %v965_v40 = vadd.f32 %v962_v38, %v950_v30  ;;  %v540_v41 = vpop.f32.mrb[3].mxu0 }
  0xfe   : > { %v563_v43 = vmul.f32 %v964_v37, %v912_v33  ;;  %v966_v44 = vadd.f32 %v540_v41, %v430_v31 }
  0xff   : > { %v576_v45 = vadd.f32 %v913_v36, %v565_v39  ;;  %v566_v46 = vmul.f32 %v965_v40, %v912_v33 }
 0x100   : > { %v574_v48 = vadd.f32 %v913_v36, %v563_v43  ;;  %v564_v49 = vmul.f32 %v966_v44, %v912_v33 }
 0x101   : > { %v587_v50 = vmax.f32 %v576_v45, %v914_v42  ;;  %v577_v51 = vadd.f32 %v913_v36, %v566_v46 }
 0x102   : > { %v585_v52 = vmax.f32 %v574_v48, %v914_v42  ;;  %v575_v53 = vadd.f32 %v913_v36, %v564_v49  ;;  %611 = sbr.rel (!%p1249_p3) target bundleno = 314 (0x13a), region = 48 }
 0x103   : > { %v598_v54 = vmin.f32 %v587_v50, %v915_v47  ;;  %v588_v55 = vmax.f32 %v577_v51, %v914_v42 }
 0x104   : > { %v596_v56 = vmin.f32 %v585_v52, %v915_v47  ;;  %v586_v57 = vmax.f32 %v575_v53, %v914_v42 }
 0x105   : > { %603 = vst.msk [vmem:[%s1290_s9 + $0x10] sm:$0xff] %vm600_vm2, %v598_v54  ;;  %v599_v58 = vmin.f32 %v588_v55, %v915_v47 }
 0x106   : > { %601 = vst.msk [vmem:[%s1290_s9] sm:$0xff] %vm600_vm2, %v596_v56  ;;  %v597_v59 = vmin.f32 %v586_v57, %v915_v47 }
 0x107   : > { %604 = vst.msk [vmem:[%s1290_s9 + $0x18] sm:$0xff] %vm600_vm2, %v599_v58 }
 0x108   : > { %602 = vst.msk [vmem:[%s1290_s9 + $0x8] sm:$0xff] %vm600_vm2, %v597_v59 }
 0x109   : > { %s1375_s11 = smov (!%p614_p9, %s613_s11), 4 }
 0x10a   : > { %s918_s16 = sshll.u32 %s1375_s11, 7 }
 0x10b   : > { %p921_p10 = scmp.eq.s32.totalorder %s918_s16, 0 }
 0x10c   : > { %s1309_s17 = sshrl.u32 (!%p921_p10), %s1375_s11, 2 }
 0x10d   : > { %623 = sbr.rel (%p921_p10) target bundleno = 314 (0x13a), region = 52  ;;  %p922_p11 = scmp.le.s32.totalorder (!%p921_p10), %s1309_s17, 0 }
 0x114   : > { %806 = sbr.rel (%p922_p11) target bundleno = 293 (0x125), region = 140  ;;  %s1365_s23 = smov (!%p922_p11), %s1303_s15 }
 0x115   : > { %s1366_s29 = smov (!%p922_p11), %s1290_s9  ;;  %s1318_s10 = smov (!%p922_p11), 0  }
 0x116   : > { %s1162_s18 = smov (!%p922_p11), 0  }
 0x11b LB: >> { %v691_v60 = vld [vmem:[%s1156_s29] sm:$0xff]  ;;  %v693_v61 = vld [vmem:[%s1156_s29 + $0x8] sm:$0xff]  ;;  %v695_v62 = vld [vmem:[%s1156_s29 + $0x10] sm:$0xff]  ;;  %s699_s19 = sadd.s32 1, %s1160_s10  ;;  %s685_s18 = sadd.s32 1, %s1164_s18   ;;  %s1164_s18 = sphi %s1162_s18, %s685_s18   ;;  %s1160_s10 = sphi %s1318_s10, %s1367_s10   ;;  %s1156_s29 = sphi %s1366_s29, %s704_s29   ;;  %s1152_s23 = sphi %s1365_s23, %s705_s23  }
 0x11c   : >> { %692 = vst [vmem:[%s1152_s23] sm:$0xff] %v691_v60  ;;  %694 = vst [vmem:[%s1152_s23 + $0x8] sm:$0xff] %v693_v61  ;;  %v697_v63 = vld [vmem:[%s1156_s29 + $0x18] sm:$0xff]  ;;  %p700_p12 = scmp.ge.s32.totalorder %s699_s19, %s1309_s17  ;;  %p684_p13 = scmp.ge.s32.totalorder %s685_s18, %s1309_s17 }
 0x11d   : >> { %696 = vst [vmem:[%s1152_s23 + $0x10] sm:$0xff] %v695_v62  ;;  %698 = vst [vmem:[%s1152_s23 + $0x18] sm:$0xff] %v697_v63 }
 0x11e   : >> { %s1377_s19 = smov (%p700_p12, %s699_s19), 0  ;;  %687 = sbr.rel (!%p684_p13) target bundleno = 283 (0x11b), region = 146 }
 0x11f   : >> { %s923_s20 = sshll.u32 %s1377_s19, 5  ;;  %s1367_s10 = smov %s1377_s19 }
 0x120   : >> { %s704_s29 = scalar_lea.vmem %s1290_s9, %s923_s20 [#allocation2]   ;;  %s705_s23 = scalar_lea.vmem %s1303_s15, %s923_s20  }
 0x125 PF: > { %s1334_s26 = sand.u32 3, %s1375_s11   ;;  %s934_s28 = sshll.u32 %s1309_s17, 5 }
 0x126   : > { %s710_s30 = scalar_lea.vmem %s1290_s9, %s934_s28 [#allocation2]   ;;  %s712_s8 = scalar_lea.vmem %s1303_s15, %s934_s28  }
 0x127   : > { %p928_p0 = scmp.le.s32.totalorder %s1334_s26, 0 }
 0x128   : > { %s1166_s21 = smov (!%p928_p0), %s712_s8   ;;  %s1170_s12 = smov (!%p928_p0), %s710_s30  }
 0x129   : > { %820 = sbr.rel (%p928_p0) target bundleno = 314 (0x13a), region = 151  ;;  %s1174_s13 = smov (!%p928_p0), 0  }
 0x12a   : > { %s1178_s14 = smov (!%p928_p0), 0  }
 0x130 LB: >> { %v722_v0 = vld [vmem:[%s1172_s12] sm:$0xff]  ;;  %s724_s11 = sadd.s32 1, %s1176_s13  ;;  %s716_s14 = sadd.s32 1, %s1180_s14   ;;  %s1180_s14 = sphi %s1178_s14, %s716_s14   ;;  %s1176_s13 = sphi %s1174_s13, %s1175_s13   ;;  %s1172_s12 = sphi %s1170_s12, %s729_s12   ;;  %s1168_s21 = sphi %s1166_s21, %s730_s21  }
 0x131   : >> { %723 = vst [vmem:[%s1168_s21] sm:$0xff] %v722_v0  ;;  %p725_p1 = scmp.ge.s32.totalorder %s724_s11, %s1334_s26  ;;  %p715_p2 = scmp.ge.s32.totalorder %s716_s14, %s1334_s26 }
 0x133   : >> { %s1379_s11 = smov (%p725_p1, %s724_s11), 0  ;;  %718 = sbr.rel (!%p715_p2) target bundleno = 304 (0x130), region = 157 }
 0x134   : >> { %s929_s9 = sshll.u32 %s1379_s11, 3  ;;  %s1175_s13 = smov %s1379_s11  }
 0x135   : >> { %s729_s12 = scalar_lea.vmem %s710_s30, %s929_s9 [#allocation2]   ;;  %s730_s21 = scalar_lea.vmem %s712_s8, %s929_s9  }
 0x13a PF: > { %s16_s25 = sadd.s32 1, %s1148_s25   ;;  %s1368_s21 = smov %s1136_s22 }
 0x13b   : > { %p13_p3 = scmp.ge.s32.totalorder %s16_s25, 6   ;;  %s1369_s22 = smov %s1258_s7 }
 0x13c   : > { %s1370_s23 = smov %s1144_s24  ;;  %s1371_s24 = smov %s1373_s27 }
 0x13d   :  { %15 = sbr.rel (!%p13_p3) target bundleno = 3 (0x3), region = 168 }

</bundles_post_ra>
